<compile_context>
chip_gen: v6e
topology: v6e:2x2x1
jax: 0.10.0
libtpu: 0.0.40
codegen_flags: <defaults>
</compile_context>

<pallas_src>
import math

import jax
import jax.numpy as jnp
from jax.experimental import pallas as pl
from jax.experimental.pallas import tpu as pltpu


_D = 256
_TM_MAX = 4096   # rows per tile: 4 MiB f32 (2 MiB bf16); <=3 buffers stays well under 32 MiB


def _cdiv(a, b):
    return -(-a // b)


def _num_tensorcores():
    """2 on v7x (2 TensorCores/chip -> shard the 'parallel' batch axis), else 1."""
    try:
        kind = (jax.devices()[0].device_kind or "").lower()
    except Exception:
        return 1
    return 2 if "v7" in kind else 1


def policy_kernel(x_ref, w_ref, b_ref, o_ref):
    # x_ref: (TM, 256)           streamed batch tile (f32, or bf16 upcast below)
    # w_ref: (1, 256)    f32     weight row, resident across grid steps
    # b_ref: (1, 1)      f32     scalar bias in SMEM
    # o_ref: (1, TM//128, 128)   f32 lane-dense output tile
    _, g, l = o_ref.shape
    # N=1 matvec on the VPU/XLU (broadcast multiply + lane reduce) — the MXU
    # would waste >99% of its columns.  Accumulate in f32.
    x = x_ref[...].astype(jnp.float32)
    z = jnp.sum(x * w_ref[...], axis=-1)        # (TM,)
    z = z + b_ref[0, 0]                         # scalar bias from SMEM
    # Sublane->lane relayout into a lane-dense slab: store is a full-lane vst.
    o_ref[...] = jnp.tanh(z).reshape(1, g, l).astype(o_ref.dtype)


def policy_forward(x, w, b, *, tm_max=_TM_MAX, compute_dtype=None):
    """tanh(x @ w.T + b).  x: [B, 256], w: [1, 256], b: [1] -> [B, 1] f32."""
    B, D = x.shape
    assert D == _D and w.shape == (1, D) and b.shape == (1,)

    if compute_dtype is not None:
        # Optional HBM-traffic saver (e.g. bf16 halves the x read); in-kernel
        # accumulation stays f32.
        x = x.astype(compute_dtype)
    w_row = w.astype(jnp.float32)                 # (1, 256) resident weight row
    b_smem = b.reshape(1, 1).astype(jnp.float32)  # (1, 1) scalar for SMEM

    # ---- batch tiling: no padding copy of x ----
    # Balanced tiles, at least one per TensorCore, each a multiple of 128 rows
    # and capped at tm_max.  The last tile may overhang B; Pallas DMAs only the
    # in-bounds rows and the junk results are sliced off below.
    b128 = _cdiv(B, 128) * 128
    n_cores = _num_tensorcores()
    tiles = max(_cdiv(b128, tm_max), n_cores)
    tm = min(tm_max, _cdiv(_cdiv(b128, tiles), 128) * 128)
    num_tiles = _cdiv(b128, tm)
    g = tm // 128

    # Streamed x tile; triple-buffer when the grid is long enough to benefit.
    x_map = lambda i: (i, 0)
    x_spec = pl.BlockSpec((tm, D), x_map)
    if num_tiles >= 3 and hasattr(pl, "Buffered"):
        try:
            x_spec = pl.BlockSpec((tm, D), x_map, pipeline_mode=pl.Buffered(3))
        except TypeError:  # older jax without pipeline_mode on BlockSpec
            x_spec = pl.BlockSpec((tm, D), x_map)

    itemsize = jnp.dtype(x.dtype).itemsize
    cost = pl.CostEstimate(
        flops=2 * B * D,
        transcendentals=B,
        bytes_accessed=B * D * itemsize + D * 4 + num_tiles * tm * 4,
    )

    out = pl.pallas_call(
        policy_kernel,
        out_shape=jax.ShapeDtypeStruct((num_tiles, g, 128), jnp.float32),
        grid_spec=pltpu.PrefetchScalarGridSpec(
            num_scalar_prefetch=0,
            grid=(num_tiles,),
            in_specs=[
                x_spec,                                              # streamed x tile
                pl.BlockSpec((1, D), lambda i: (0, 0)),              # resident weight
                pl.BlockSpec(memory_space=pltpu.MemorySpace.SMEM),   # scalar bias
            ],
            out_specs=pl.BlockSpec((1, g, 128), lambda i: (i, 0, 0)),  # lane-dense out
        ),
        compiler_params=pltpu.CompilerParams(
            dimension_semantics=("parallel",),          # v7x: shard tiles across TCs
            vmem_limit_bytes=32 * 1024 * 1024,          # safe on v5e/v6e/v7x
        ),
        cost_estimate=cost,
    )(x, w_row, b_smem)

    # (num_tiles, g, 128) row-major == batch order; rows >= B (ragged last tile
    # / 128-row rounding) are junk and are sliced off here.
    return out.reshape(num_tiles * tm, 1)[:B]


def init_params(key):
    # nn.Linear(256, 1): weight (1, 256) xavier_uniform, bias (1,) default
    # uniform(-1/sqrt(256), 1/sqrt(256)) -- matches the PyTorch module.
    kw, kb = jax.random.split(key)
    fan_in, fan_out = 256, 1
    bound_w = math.sqrt(6.0 / (fan_in + fan_out))   # xavier_uniform, gain=1
    w = jax.random.uniform(kw, (fan_out, fan_in), jnp.float32,
                           minval=-bound_w, maxval=bound_w)
    bound_b = 1.0 / math.sqrt(fan_in)
    b = jax.random.uniform(kb, (fan_out,), jnp.float32,
                           minval=-bound_b, maxval=bound_b)
    return w, b


def _reference(x, w, b):
    # Same math as the module (Linear + Tanh), kept as an explicit f32
    # multiply-reduce so the check is MXU-precision independent.
    return jnp.tanh(jnp.sum(x * w[0][None, :], axis=-1, keepdims=True) + b[None, :])


if __name__ == "__main__":
    key = jax.random.PRNGKey(0)
    k_x, k_x2, k_p = jax.random.split(key, 3)
    w, b = init_params(k_p)

    # Small smoke test.
    B = 8
    x = jax.random.normal(k_x, (B, _D), dtype=jnp.float32)
    out = jax.block_until_ready(policy_forward(x, w, b))
    assert out.shape == (B, 1)
    assert jnp.allclose(out, _reference(x, w, b), atol=1e-5, rtol=1e-5)

    # Ragged batch (not a multiple of 128) exercises the partial-tile path.
    B2 = 300
    x2 = jax.random.normal(k_x2, (B2, _D), dtype=jnp.float32)
    out2 = jax.block_until_ready(policy_forward(x2, w, b))
    assert out2.shape == (B2, 1)
    assert jnp.allclose(out2, _reference(x2, w, b), atol=1e-5, rtol=1e-5)

    print("KERNEL_OK")
</pallas_src>

<mosaic_0001>
module attributes {stable_mosaic.version = 11 : i64} {
  func.func @policy_kernel(%arg0: i32, %arg1: memref<128x256xf32, #tpu.memory_space<vmem>>, %arg2: memref<1x256xf32, #tpu.memory_space<vmem>>, %arg3: memref<1x1xf32, #tpu.memory_space<smem>>, %arg4: memref<1x1x128xf32, #tpu.memory_space<vmem>>) attributes {dimension_semantics = [#tpu.dimension_semantics<parallel>], iteration_bounds = array<i64: 1>, scalar_prefetch = 0 : i64, scratch_operands = 0 : i64, tpu.core_type = #tpu.core_type<tc>, window_params = [{transform_indices = @transform_0, window_bounds = array<i64: 128, 256>}, {pipeline_mode = #tpu.pipeline_mode<synchronous>, transform_indices = @transform_1, window_bounds = array<i64: 1, 256>}, {transform_indices = @transform_2, window_bounds = array<i64: 1, 1>}, {transform_indices = @transform_3, window_bounds = array<i64: 1, 1, 128>}]} {
    %c0 = arith.constant 0 : index
    %c0_0 = arith.constant 0 : index
    %0 = vector.load %arg1[%c0, %c0_0] : memref<128x256xf32, #tpu.memory_space<vmem>>, vector<128x256xf32>
    %c0_1 = arith.constant 0 : index
    %c0_2 = arith.constant 0 : index
    %1 = vector.load %arg2[%c0_1, %c0_2] : memref<1x256xf32, #tpu.memory_space<vmem>>, vector<1x256xf32>
    %2 = vector.broadcast %1 : vector<1x256xf32> to vector<128x256xf32>
    %3 = arith.mulf %0, %2 : vector<128x256xf32>
    %cst = arith.constant dense<0.000000e+00> : vector<128xf32>
    %4 = vector.multi_reduction <add>, %3, %cst [1] : vector<128x256xf32> to vector<128xf32>
    %c0_3 = arith.constant 0 : index
    %c0_4 = arith.constant 0 : index
    %5 = memref.load %arg3[%c0_3, %c0_4] : memref<1x1xf32, #tpu.memory_space<smem>>
    %6 = vector.broadcast %5 : f32 to vector<128xf32>
    %7 = arith.addf %4, %6 : vector<128xf32>
    %8 = math.tanh %7 : vector<128xf32>
    %9 = vector.shape_cast %8 : vector<128xf32> to vector<1x1x128xf32>
    %c0_5 = arith.constant 0 : index
    %c0_6 = arith.constant 0 : index
    %c0_7 = arith.constant 0 : index
    %10 = vector.load %arg4[%c0_5, %c0_6, %c0_7] : memref<1x1x128xf32, #tpu.memory_space<vmem>>, vector<1x1x128xf32>
    tpu.vector_store %arg4[%c0_5, %c0_6, %c0_7], %9 {strides = array<i32>} : memref<1x1x128xf32, #tpu.memory_space<vmem>>, vector<1x1x128xf32>,
    return
  }
  func.func @transform_0(%arg0: i32) -> (i32, i32) {
    %c0_i32 = arith.constant 0 : i32
    %c0_i32_0 = arith.constant 0 : i32
    return %arg0, %c0_i32 : i32, i32
  }
  func.func @transform_1(%arg0: i32) -> (i32, i32) {
    %c0_i32 = arith.constant 0 : i32
    %c0_i32_0 = arith.constant 0 : i32
    %c0_i32_1 = arith.constant 0 : i32
    return %c0_i32, %c0_i32_0 : i32, i32
  }
  func.func @transform_2(%arg0: i32) -> (i32, i32) {
    %c0_i32 = arith.constant 0 : i32
    %c0_i32_0 = arith.constant 0 : i32
    %c0_i32_1 = arith.constant 0 : i32
    return %c0_i32, %c0_i32_0 : i32, i32
  }
  func.func @transform_3(%arg0: i32) -> (i32, i32, i32) {
    %c0_i32 = arith.constant 0 : i32
    %c0_i32_0 = arith.constant 0 : i32
    %c0_i32_1 = arith.constant 0 : i32
    return %arg0, %c0_i32, %c0_i32_0 : i32, i32, i32
  }
}

</mosaic_0001>

<bundles_post_ra>
// kernel: tpu_custom_call.1
= control target key start
LH: loop header
LB: loop body
LE: loop exit
PB: predicated region body
PF: predicated region fallthrough
CT: control target
= control target key end

     0   :  { %9 = vsyncpa [#allocation4], 0  ;;  %s633_s0 = inlined_call_operand.hbm [shape: f32[8,256], index: 0, kind: input, shape index: {}]   ;;  %s634_s1 = inlined_call_operand.vmem [shape: f32[1,256], index: 1, kind: input, shape index: {}]   ;;  %s635_s2 = inlined_call_operand.<no memory space> [shape: f32[1,1], index: 2, kind: input, shape index: {}]   ;;  %s636_s3 = inlined_call_operand.hbm [shape: f32[1,1,128], index: 3, kind: output, shape index: {}]  }
   0x1   :  { %10 = vsyncpa [#allocation5], 0 }
   0x2   :  { %15 = vsyncadd [#allocation4], 3840  ;;  %s412_s12 = smov [#allocation3]  }
   0x3   :  { %s16_s13 = sshll.u32 %s412_s12, 4  ;;  %s17_s13 = int_to_ptr.vmem [resolvable:$true] %s16_s13 }
   0x4   :  { %s376_s14 = scalar_lea.vmem %s17_s13, 256  ;;  %s380_s15 = scalar_lea.vmem %s17_s13, 4096 }
   0x5   :  { %p377_p0 = scmp.ne.s32.totalorder %s17_s13, %s376_s14  ;;  %p381_p1 = scmp.lt.s32.totalorder %s17_s13, %s17_s13 }
   0x6   :  { %p382_p2 = scmp.lt.s32.totalorder %s380_s15, %s376_s14 }
   0x8   :  { %p383_p3 = por %p382_p2, %p381_p1 }
   0xa   :  { %p384_p4 = pnand %p383_p3, %p377_p0 }
   0xc   :  { %387 = shalt.err (!%p384_p4)
}
   0xd   :  { %s413_s16 = smov 256   ;;  %s414_s17 = smov 16  }
   0xe   :  { %22 = dma.hbm_to_vmem [thread:$0]  %s633_s0, 256, %s17_s13, [#allocation4], %s413_s16, %s413_s16, %s414_s17  }
   0xf   :  { %408 = dma.done.wait [#allocation4], 4096  }
  0x10   :  { %409 = vsyncadd [#allocation4], 4294963200  ;;  %v64_v0 = vlaneseq  ;;  %v30_v6 = vld [vmem:[#allocation3] sm:$0xff]  ;;  %v31_v7 = vld [vmem:[#allocation3 + $0x8] sm:$0xff]  ;;  %vm215_vm0 = vcmask 130112   ;;  %vm222_vm1 = vcmask 195712  }
  0x11   :  { %v62_v8 = vld [vmem:[%s634_s1] sm:$0x3]  ;;  %v35_v12 = vld [vmem:[#allocation3 + $0x28] sm:$0xff]  ;;  %v32_v13 = vld [vmem:[#allocation3 + $0x10] sm:$0xff]  ;;  %vm229_vm2 = vcmask 261312   ;;  %vm236_vm3 = vcmask 326912  }
  0x12   :  { %v439_v1 = vshrl.u32 %v64_v0, 7  ;;  %v441_v2 = vand.u32 127, %v64_v0  ;;  %v34_v11 = vld [vmem:[#allocation3 + $0x20] sm:$0xff]  ;;  %v33_v14 = vld [vmem:[#allocation3 + $0x18] sm:$0xff]  ;;  %v36_v15 = vld [vmem:[#allocation3 + $0x30] sm:$0xff]  ;;  %vm243_vm4 = vcmask 392512  }
  0x13   :  { %v37_v16 = vld [vmem:[#allocation3 + $0x38] sm:$0xff]  ;;  %v38_v21 = vld [vmem:[#allocation3 + $0x40] sm:$0xff]  ;;  %v39_v22 = vld [vmem:[#allocation3 + $0x48] sm:$0xff]  ;;  %vm250_vm5 = vcmask 458112   ;;  %vm257_vm6 = vcmask 523712   ;;  %vm264_vm7 = vcmask 589312  }
  0x14   :  { %v66_v3 = vsub.s32 0, %v439_v1  ;;  %v70_v4 = vsub.s32 1, %v439_v1  ;;  %v208_v5 = vsub.s32 %v441_v2, %v439_v1  ;;  %v40_v27 = vld [vmem:[#allocation3 + $0x50] sm:$0xff]  ;;  %v41_v28 = vld [vmem:[#allocation3 + $0x58] sm:$0xff]  ;;  %v42_v37 = vld [vmem:[#allocation3 + $0x60] sm:$0xff]  ;;  %vm271_vm8 = vcmask 654912  }
  0x15   :  { %v43_v38 = vld [vmem:[#allocation3 + $0x68] sm:$0xff]  ;;  %v44_v39 = vld [vmem:[#allocation3 + $0x70] sm:$0xff]  ;;  %v45_v40 = vld [vmem:[#allocation3 + $0x78] sm:$0xff]  ;;  %vm278_vm9 = vcmask 720512   ;;  %vm285_vm10 = vcmask 786112   ;;  %vm292_vm11 = vcmask 851712  }
  0x16   :  { %v450_v9 = vrot.slane %v62_v8, %v66_v3  ;;  %v452_v10 = vrot.slane %v62_v8, %v70_v4  ;;  %v46_v47 = vld [vmem:[#allocation3 + $0x80] sm:$0xff]  ;;  %v47_v48 = vld [vmem:[#allocation3 + $0x88] sm:$0xff]  ;;  %v48_v49 = vld [vmem:[#allocation3 + $0x90] sm:$0xff]  ;;  %vm299_vm12 = vcmask 917312   ;;  %vm306_vm13 = vcmask 982912  }
  0x17   :  { %v49_v50 = vld [vmem:[#allocation3 + $0x98] sm:$0xff]  ;;  %v50_v57 = vld [vmem:[#allocation3 + $0xa0] sm:$0xff]  ;;  %v51_v58 = vld [vmem:[#allocation3 + $0xa8] sm:$0xff]  ;;  %vm313_vm14 = vcmask 1048512  }
  0x18   :  { %v74_v17 = vmul.f32 %v450_v9, %v30_v6  ;;  %v75_v18 = vmul.f32 %v452_v10, %v31_v7  ;;  %v78_v19 = vmul.f32 %v450_v9, %v34_v11  ;;  %v79_v20 = vmul.f32 %v452_v10, %v35_v12  ;;  %v52_v59 = vld [vmem:[#allocation3 + $0xb0] sm:$0xff]  ;;  %v53_v60 = vld [vmem:[#allocation3 + $0xb8] sm:$0xff]  ;;  %v54_v6 = vld [vmem:[#allocation3 + $0xc0] sm:$0xff] }
  0x19   :  { %v76_v23 = vmul.f32 %v450_v9, %v32_v13  ;;  %v77_v24 = vmul.f32 %v452_v10, %v33_v14  ;;  %v80_v25 = vmul.f32 %v450_v9, %v36_v15  ;;  %v81_v26 = vmul.f32 %v452_v10, %v37_v16  ;;  %v55_v7 = vld [vmem:[#allocation3 + $0xc8] sm:$0xff]  ;;  %v56_v8 = vld [vmem:[#allocation3 + $0xd0] sm:$0xff]  ;;  %v57_v11 = vld [vmem:[#allocation3 + $0xd8] sm:$0xff] }
  0x1a   :  { %v106_v29 = vadd.f32 %v75_v18, %v74_v17  ;;  %v112_v30 = vadd.f32 %v79_v20, %v78_v19  ;;  %v82_v32 = vmul.f32 %v450_v9, %v38_v21  ;;  %v83_v33 = vmul.f32 %v452_v10, %v39_v22  ;;  %v58_v18 = vld [vmem:[#allocation3 + $0xe0] sm:$0xff]  ;;  %v59_v19 = vld [vmem:[#allocation3 + $0xe8] sm:$0xff]  ;;  %v60_v20 = vld [vmem:[#allocation3 + $0xf0] sm:$0xff] }
  0x1b   :  { %v109_v31 = vadd.f32 %v77_v24, %v76_v23  ;;  %v115_v34 = vadd.f32 %v81_v26, %v80_v25  ;;  %v84_v35 = vmul.f32 %v450_v9, %v40_v27  ;;  %v85_v36 = vmul.f32 %v452_v10, %v41_v28  ;;  %v61_v21 = vld [vmem:[#allocation3 + $0xf8] sm:$0xff] }
  0x1c   :  { %107 = vadd.xlane.f32.xlu0 %v106_v29  ;;  %113 = vadd.xlane.f32.xlu1 %v112_v30  ;;  %v118_v41 = vadd.f32 %v83_v33, %v82_v32  ;;  %v86_v42 = vmul.f32 %v450_v9, %v42_v37  ;;  %v87_v43 = vmul.f32 %v452_v10, %v43_v38  ;;  %v487_v28 = vadd.s32 4294967280, %v441_v2 }
  0x1d   :  { %v121_v44 = vadd.f32 %v85_v36, %v84_v35  ;;  %v88_v45 = vmul.f32 %v450_v9, %v44_v39  ;;  %v89_v46 = vmul.f32 %v452_v10, %v45_v40  ;;  %v90_v52 = vmul.f32 %v450_v9, %v46_v47 }
  0x1e   :  { %v124_v51 = vadd.f32 %v87_v43, %v86_v42  ;;  %v91_v53 = vmul.f32 %v452_v10, %v47_v48  ;;  %v92_v55 = vmul.f32 %v450_v9, %v48_v49  ;;  %v93_v56 = vmul.f32 %v452_v10, %v49_v50 }
  0x1f   :  { %v127_v54 = vadd.f32 %v89_v46, %v88_v45  ;;  %v94_v61 = vmul.f32 %v450_v9, %v50_v57  ;;  %v95_v62 = vmul.f32 %v452_v10, %v51_v58  ;;  %v96_v63 = vmul.f32 %v450_v9, %v52_v59 }
  0x20   :  { %110 = vadd.xlane.f32.xlu0 %v109_v31  ;;  %116 = vadd.xlane.f32.xlu1 %v115_v34  ;;  %v130_v0 = vadd.f32 %v91_v53, %v90_v52  ;;  %v133_v3 = vadd.f32 %v93_v56, %v92_v55  ;;  %v97_v4 = vmul.f32 %v452_v10, %v53_v60  ;;  %v492_v32 = vadd.s32 4294967288, %v441_v2 }
  0x21   :  { %v136_v12 = vadd.f32 %v95_v62, %v94_v61  ;;  %v98_v13 = vmul.f32 %v450_v9, %v54_v6  ;;  %v99_v14 = vmul.f32 %v452_v10, %v55_v7  ;;  %v100_v16 = vmul.f32 %v450_v9, %v56_v8 }
  0x22   :  { %v139_v15 = vadd.f32 %v97_v4, %v96_v63  ;;  %v101_v17 = vmul.f32 %v452_v10, %v57_v11  ;;  %v102_v23 = vmul.f32 %v450_v9, %v58_v18  ;;  %v103_v24 = vmul.f32 %v452_v10, %v59_v19 }
  0x23   :  { %v142_v22 = vadd.f32 %v99_v14, %v98_v13  ;;  %v104_v26 = vmul.f32 %v450_v9, %v60_v20  ;;  %v105_v27 = vmul.f32 %v452_v10, %v61_v21  ;;  %v220_v31 = vsub.s32 %v487_v28, %v439_v1 }
  0x24   :  { %119 = vadd.xlane.f32.xlu0 %v118_v41  ;;  %122 = vadd.xlane.f32.xlu1 %v121_v44  ;;  %v145_v25 = vadd.f32 %v101_v17, %v100_v16  ;;  %v148_v29 = vadd.f32 %v103_v24, %v102_v23  ;;  %v495_v33 = vadd.s32 4294967272, %v441_v2  ;;  %v213_v9 = vsub.s32 %v492_v32, %v439_v1 }
  0x25   :  { %v151_v30 = vadd.f32 %v105_v27, %v104_v26  ;;  %v502_v34 = vadd.s32 4294967264, %v441_v2  ;;  %v505_v35 = vadd.s32 4294967256, %v441_v2  ;;  %v512_v38 = vadd.s32 4294967248, %v441_v2 }
  0x26   :  { %v227_v10 = vsub.s32 %v495_v33, %v439_v1  ;;  %v515_v39 = vadd.s32 4294967240, %v441_v2  ;;  %v522_v42 = vadd.s32 4294967232, %v441_v2  ;;  %v525_v43 = vadd.s32 4294967224, %v441_v2 }
  0x27   :  { %v234_v36 = vsub.s32 %v502_v34, %v439_v1  ;;  %v241_v37 = vsub.s32 %v505_v35, %v439_v1  ;;  %v248_v40 = vsub.s32 %v512_v38, %v439_v1  ;;  %v532_v46 = vadd.s32 4294967216, %v441_v2 }
  0x28   :  { %125 = vadd.xlane.f32.xlu0 %v124_v51  ;;  %128 = vadd.xlane.f32.xlu1 %v127_v54  ;;  %v255_v41 = vsub.s32 %v515_v39, %v439_v1  ;;  %v262_v44 = vsub.s32 %v522_v42, %v439_v1  ;;  %v269_v45 = vsub.s32 %v525_v43, %v439_v1  ;;  %v535_v47 = vadd.s32 4294967208, %v441_v2 }
  0x29   :  { %v276_v48 = vsub.s32 %v532_v46, %v439_v1  ;;  %v542_v50 = vadd.s32 4294967200, %v441_v2  ;;  %v545_v51 = vadd.s32 4294967192, %v441_v2  ;;  %v552_v54 = vadd.s32 4294967184, %v441_v2 }
  0x2a   :  { %v283_v49 = vsub.s32 %v535_v47, %v439_v1  ;;  %v555_v55 = vadd.s32 4294967176, %v441_v2  ;;  %v564_v58 = vstv %s635_s2  ;;  %s415_s2 = smov [#allocation6]  }
  0x2b   :  { %v290_v52 = vsub.s32 %v542_v50, %v439_v1  ;;  %v297_v53 = vsub.s32 %v545_v51, %v439_v1  ;;  %v304_v56 = vsub.s32 %v552_v54, %v439_v1  ;;  %s323_s22 = sshll.u32 %s415_s2, 4  ;;  %s324_s22 = int_to_ptr.vmem [resolvable:$true] %s323_s22 }
  0x2c   :  { %131 = vadd.xlane.f32.xlu0 %v130_v0  ;;  %134 = vadd.xlane.f32.xlu1 %v133_v3  ;;  %v311_v57 = vsub.s32 %v555_v55, %v439_v1  ;;  %s388_s23 = scalar_lea.vmem %s324_s22, 16  ;;  %s392_s24 = scalar_lea.vmem %s324_s22, 32 }
  0x2d   :  { %p389_p5 = scmp.ne.s32.totalorder %s324_s22, %s388_s23  ;;  %p393_p6 = scmp.lt.s32.totalorder %s324_s22, %s324_s22 }
  0x2e   :  { %p394_p7 = scmp.lt.s32.totalorder %s392_s24, %s388_s23 }
  0x30   :  { %137 = vadd.xlane.f32.xlu0 %v136_v12  ;;  %140 = vadd.xlane.f32.xlu1 %v139_v15  ;;  %p395_p8 = por %p394_p7, %p393_p6 }
  0x32   :  { %p396_p9 = pnand %p395_p8, %p389_p5 }
  0x34   :  { %143 = vadd.xlane.f32.xlu0 %v142_v22  ;;  %146 = vadd.xlane.f32.xlu1 %v145_v25 }
  0x38   :  { %149 = vadd.xlane.f32.xlu0 %v148_v29  ;;  %152 = vadd.xlane.f32.xlu1 %v151_v30 }
  0xa5   :  { %v108_v59 = vpop.xlane.xlu0 %107  ;;  %v114_v60 = vpop.xlane.xlu1 %113 }
  0xa6   :  { %v156_v61 = vadd.f32 %v564_v58, %v108_v59  ;;  %v158_v62 = vadd.f32 %v564_v58, %v114_v60 }
  0xa8   :  { %336 = vtanh.f32 %v156_v61 }
  0xa9   :  { %v111_v63 = vpop.xlane.xlu0 %110  ;;  %v117_v0 = vpop.xlane.xlu1 %116  ;;  %338 = vtanh.f32 %v158_v62 }
  0xaa   :  { %v157_v3 = vadd.f32 %v564_v58, %v111_v63  ;;  %v159_v4 = vadd.f32 %v564_v58, %v117_v0 }
  0xac   :  { %340 = vtanh.f32 %v157_v3 }
  0xad   :  { %342 = vtanh.f32 %v159_v4  ;;  %v120_v6 = vpop.xlane.xlu0 %119  ;;  %v123_v7 = vpop.xlane.xlu1 %122 }
  0xae   :  { %v160_v8 = vadd.f32 %v564_v58, %v120_v6  ;;  %v161_v11 = vadd.f32 %v564_v58, %v123_v7 }
  0xb0   :  { %344 = vtanh.f32 %v160_v8 }
  0xb1   :  { %346 = vtanh.f32 %v161_v11  ;;  %v126_v12 = vpop.xlane.xlu0 %125  ;;  %v129_v13 = vpop.xlane.xlu1 %128 }
  0xb2   :  { %v162_v14 = vadd.f32 %v564_v58, %v126_v12  ;;  %v163_v15 = vadd.f32 %v564_v58, %v129_v13 }
  0xb4   :  { %348 = vtanh.f32 %v162_v14 }
  0xb5   :  { %350 = vtanh.f32 %v163_v15  ;;  %v132_v16 = vpop.xlane.xlu0 %131  ;;  %v135_v17 = vpop.xlane.xlu1 %134 }
  0xb6   :  { %v164_v18 = vadd.f32 %v564_v58, %v132_v16  ;;  %v165_v19 = vadd.f32 %v564_v58, %v135_v17  ;;  %v337_v20 = vpop.eup %336 }
  0xb7   :  { %v339_v21 = vpop.eup %338  ;;  %v209_v26 = vrot.slane %v337_v20, %v208_v5 }
  0xb8   :  { %352 = vtanh.f32 %v164_v18  ;;  %v221_v59 = vrot.slane %v339_v21, %v220_v31 }
  0xb9   :  { %v341_v22 = vpop.eup %340  ;;  %354 = vtanh.f32 %v165_v19  ;;  %v138_v23 = vpop.xlane.xlu0 %137 }
  0xba   :  { %v141_v24 = vpop.xlane.xlu1 %140  ;;  %v343_v25 = vpop.eup %342  ;;  %v214_v27 = vrot.slane %v341_v22, %v213_v9  ;;  %v166_v29 = vadd.f32 %v564_v58, %v138_v23 }
  0xbb   :  { %v167_v30 = vadd.f32 %v564_v58, %v141_v24  ;;  %v228_v60 = vrot.slane %v343_v25, %v227_v10 }
  0xbc   :  { %v216_v61 = vsel %vm215_vm0, %v214_v27, %v209_v26  ;;  %356 = vtanh.f32 %v166_v29 }
  0xbd   :  { %v345_v2 = vpop.eup %344  ;;  %v223_v5 = vsel %vm222_vm1, %v221_v59, %v216_v61  ;;  %358 = vtanh.f32 %v167_v30  ;;  %v144_v32 = vpop.xlane.xlu0 %143 }
  0xbe   :  { %v147_v9 = vpop.xlane.xlu1 %146  ;;  %v347_v62 = vpop.eup %346  ;;  %v230_v63 = vsel %vm229_vm2, %v228_v60, %v223_v5  ;;  %v235_v28 = vrot.slane %v345_v2, %v234_v36  ;;  %v168_v31 = vadd.f32 %v564_v58, %v144_v32 }
  0xbf   :  { %v169_v33 = vadd.f32 %v564_v58, %v147_v9  ;;  %v242_v10 = vrot.slane %v347_v62, %v241_v37 }
  0xc0   :  { %v237_v0 = vsel %vm236_vm3, %v235_v28, %v230_v63  ;;  %360 = vtanh.f32 %v168_v31 }
  0xc1   :  { %v349_v3 = vpop.eup %348  ;;  %v244_v4 = vsel %vm243_vm4, %v242_v10, %v237_v0  ;;  %362 = vtanh.f32 %v169_v33  ;;  %v150_v6 = vpop.xlane.xlu0 %149 }
  0xc2   :  { %v153_v7 = vpop.xlane.xlu1 %152  ;;  %v351_v8 = vpop.eup %350  ;;  %v249_v34 = vrot.slane %v349_v3, %v248_v40  ;;  %v170_v36 = vadd.f32 %v564_v58, %v150_v6 }
  0xc3   :  { %v171_v11 = vadd.f32 %v564_v58, %v153_v7  ;;  %v256_v35 = vrot.slane %v351_v8, %v255_v41 }
  0xc4   :  { %v251_v37 = vsel %vm250_vm5, %v249_v34, %v244_v4  ;;  %364 = vtanh.f32 %v170_v36 }
  0xc5   :  { %v353_v12 = vpop.eup %352  ;;  %v258_v13 = vsel %vm257_vm6, %v256_v35, %v251_v37  ;;  %366 = vtanh.f32 %v171_v11 }
  0xc6   :  { %v355_v14 = vpop.eup %354  ;;  %v263_v38 = vrot.slane %v353_v12, %v262_v44 }
  0xc7   :  { %v270_v40 = vrot.slane %v355_v14, %v269_v45 }
  0xc8   :  { %v265_v58 = vsel %vm264_vm7, %v263_v38, %v258_v13 }
  0xc9   :  { %v357_v15 = vpop.eup %356  ;;  %v272_v39 = vsel %vm271_vm8, %v270_v40, %v265_v58 }
  0xca   :  { %v359_v41 = vpop.eup %358  ;;  %v277_v16 = vrot.slane %v357_v15, %v276_v48 }
  0xcb   :  { %v284_v42 = vrot.slane %v359_v41, %v283_v49 }
  0xcc   :  { %v279_v44 = vsel %vm278_vm9, %v277_v16, %v272_v39 }
  0xcd   :  { %v361_v17 = vpop.eup %360  ;;  %v286_v18 = vsel %vm285_vm10, %v284_v42, %v279_v44 }
  0xce   :  { %v363_v43 = vpop.eup %362  ;;  %v291_v45 = vrot.slane %v361_v17, %v290_v52 }
  0xcf   :  { %v298_v46 = vrot.slane %v363_v43, %v297_v53 }
  0xd0   :  { %v293_v48 = vsel %vm292_vm11, %v291_v45, %v286_v18 }
  0xd1   :  { %v365_v19 = vpop.eup %364  ;;  %v300_v20 = vsel %vm299_vm12, %v298_v46, %v293_v48 }
  0xd2   :  { %v367_v47 = vpop.eup %366  ;;  %v305_v49 = vrot.slane %v365_v19, %v304_v56 }
  0xd3   :  { %v312_v50 = vrot.slane %v367_v47, %v311_v57 }
  0xd4   :  { %v307_v52 = vsel %vm306_vm13, %v305_v49, %v300_v20 }
  0xd5   :  { %v314_v51 = vsel %vm313_vm14, %v312_v50, %v307_v52 }
  0xd6   :  { %316 = vst [vmem:[#allocation6] sm:$0x1] %v314_v51 }
  0xd7   :  { %399 = shalt.err (!%p396_p9)
}
  0xd8   :  { %326 = dma.vmem_to_hbm [thread:$0]  %s324_s22, 16, %s636_s3, [#allocation5]  }
  0xd9   :  { %410 = dma.done.wait [#allocation5], 16  }
  0xda   :  { %411 = vsyncadd [#allocation5], 4294967280 }
  0xdb   :  { %330 = vsyncpa [#allocation4], 1 }
  0xdc   :  { %331 = vsyncpa [#allocation5], 1 }

</bundles_post_ra>
